<compile_context>
chip_gen: v7x
topology: tpu7x:2x2x1
jax: 0.10.0
libtpu: 0.0.40
codegen_flags: <defaults>
</compile_context>

<pallas_src>
import functools

import jax
import jax.numpy as jnp
from jax.experimental import pallas as pl
from jax.experimental.pallas import tpu as pltpu

LANE = 128
SUBLANE = 8


def _round_up(x: int, m: int) -> int:
    return (x + m - 1) // m * m


def _pad2d(x, rows, cols):
    return jnp.pad(x, ((0, rows - x.shape[0]), (0, cols - x.shape[1])))


def actor_kernel(obs_ref, w1_ref, b1_ref, w2_ref, b2_ref, w3_ref, b3_ref, out_ref):
    x = obs_ref[...]                                                   # [TB, obs_dim]
    # linear1 + relu (MXU accumulates in f32; elementwise tail stays f32 -> v5e-safe)
    h1 = jnp.dot(x, w1_ref[...], preferred_element_type=jnp.float32) + b1_ref[...]
    h1 = jnp.maximum(h1, 0.0)                                          # [TB, H_P] f32
    # linear2 + relu
    h2 = jnp.dot(h1.astype(w2_ref.dtype), w2_ref[...],
                 preferred_element_type=jnp.float32) + b2_ref[...]
    h2 = jnp.maximum(h2, 0.0)                                          # [TB, H_P] f32
    # linear3 + tanh
    y = jnp.dot(h2.astype(w3_ref.dtype), w3_ref[...],
                preferred_element_type=jnp.float32) + b3_ref[...]
    out_ref[...] = jnp.tanh(y).astype(out_ref.dtype)                   # [TB, A_P]


@functools.partial(jax.jit, static_argnames=("block_b", "compute_dtype"))
def actor_forward(obs, params, *, block_b: int = 1024, compute_dtype=jnp.bfloat16):
    """obs: [B, obs_dim] f32. params: dict w1,b1,w2,b2,w3,b3 ([in,out] weights).

    Returns f32 [B, action_dim] (matches the PyTorch module's output dtype).
    Note: with the default compute_dtype=bf16 both obs and weights are fed to
    the MXU in bf16 (f32 accumulate); pass compute_dtype=jnp.float32 for a
    bit-faithful f32 path.
    """
    w1, b1, w2, b2, w3, b3 = (params[k] for k in ("w1", "b1", "w2", "b2", "w3", "b3"))
    B, obs_dim = obs.shape
    hidden = w1.shape[1]
    action_dim = w3.shape[1]

    # Lane-pad only the hidden/action feature dims (to 128, not 256).
    h_p = _round_up(hidden, LANE)
    a_p = _round_up(action_dim, LANE)

    # Batch tile: sublane-aligned, capped at block_b, and chosen so the grid
    # has >= 2 steps whenever B allows it (lets "parallel" shard the batch
    # axis across both v7x TensorCores; harmless on v5e/v6e).
    tb_cap = max(SUBLANE, (block_b // SUBLANE) * SUBLANE)
    tb = min(tb_cap, max(SUBLANE, _round_up(pl.cdiv(B, 2), SUBLANE)))
    b_pad = _round_up(B, tb)
    grid = (b_pad // tb,)

    # obs: cast to the narrow compute dtype FIRST, pad only along batch.
    # Feature dim stays at its natural width (no lane-padded HBM copy).
    obs_p = jnp.pad(obs.astype(compute_dtype), ((0, b_pad - B), (0, 0)))

    # Zero-padded weights (padded rows/cols contribute nothing); biases f32.
    w1p = _pad2d(w1, obs_dim, h_p).astype(compute_dtype)   # rows left unpadded
    w2p = _pad2d(w2, h_p, h_p).astype(compute_dtype)
    w3p = _pad2d(w3, h_p, a_p).astype(compute_dtype)
    b1p = _pad2d(b1, 1, h_p)
    b2p = _pad2d(b2, 1, h_p)
    b3p = _pad2d(b3, 1, a_p)

    c_itemsize = jnp.dtype(compute_dtype).itemsize
    cost = pl.CostEstimate(
        flops=2 * b_pad * (obs_dim * h_p + h_p * h_p + h_p * a_p),
        transcendentals=b_pad * a_p,
        bytes_accessed=((obs_p.size + w1p.size + w2p.size + w3p.size) * c_itemsize
                        + (b1p.size + b2p.size + b3p.size) * 4
                        + b_pad * a_p * c_itemsize),
    )

    # Constant-index blocks -> params stay VMEM-resident across grid steps.
    resident = lambda shape: pl.BlockSpec(shape, lambda i: (0, 0))

    out_pad = pl.pallas_call(
        actor_kernel,
        out_shape=jax.ShapeDtypeStruct((b_pad, a_p), compute_dtype),  # lane-dense, narrow dtype
        grid=grid,
        in_specs=[
            pl.BlockSpec((tb, obs_dim), lambda i: (i, 0)),   # streamed obs tiles (natural width)
            resident((obs_dim, h_p)), resident((1, h_p)),    # layer 1
            resident((h_p, h_p)), resident((1, h_p)),        # layer 2
            resident((h_p, a_p)), resident((1, a_p)),        # layer 3
        ],
        out_specs=pl.BlockSpec((tb, a_p), lambda i: (i, 0)),
        compiler_params=pltpu.CompilerParams(
            dimension_semantics=("parallel",),               # megacore on v7x
            # NOTE: only needed when sweeping tb >= 4096 f32 on v5e:
            # vmem_limit_bytes=64 << 20,
        ),
        cost_estimate=cost,
    )(obs_p, w1p, b1p, w2p, b2p, w3p, b3p)

    # Slice off batch/lane padding and restore f32 output dtype.
    return out_pad[:B, :action_dim].astype(jnp.float32)


def init_actor_params(key, obs_dim, action_dim, hidden=64):
    """Deterministic init mimicking nn.Linear default (uniform +/- 1/sqrt(fan_in))."""
    keys = jax.random.split(key, 6)

    def linear(kw, kb, fan_in, fan_out):
        bound = 1.0 / jnp.sqrt(jnp.float32(fan_in))
        w = jax.random.uniform(kw, (fan_in, fan_out), jnp.float32, -bound, bound)
        b = jax.random.uniform(kb, (1, fan_out), jnp.float32, -bound, bound)
        return w, b

    w1, b1 = linear(keys[0], keys[1], obs_dim, hidden)
    w2, b2 = linear(keys[2], keys[3], hidden, hidden)
    w3, b3 = linear(keys[4], keys[5], hidden, action_dim)
    return {"w1": w1, "b1": b1, "w2": w2, "b2": b2, "w3": w3, "b3": b3}


def _ref_forward(obs, params):
    h1 = jnp.maximum(obs @ params["w1"] + params["b1"], 0.0)
    h2 = jnp.maximum(h1 @ params["w2"] + params["b2"], 0.0)
    return jnp.tanh(h2 @ params["w3"] + params["b3"])


if __name__ == "__main__":
    obs_dim, action_dim, batch = 32, 8, 8
    key = jax.random.PRNGKey(0)
    k_params, k_obs = jax.random.split(key)

    params = init_actor_params(k_params, obs_dim, action_dim)
    obs = jax.random.normal(k_obs, (batch, obs_dim), jnp.float32)
    ref = _ref_forward(obs, params)

    # f32 path (strict check vs. plain-JAX reference of the PyTorch forward).
    out_f32 = jax.block_until_ready(
        actor_forward(obs, params, compute_dtype=jnp.float32))
    assert out_f32.shape == (batch, action_dim)
    assert jnp.allclose(out_f32, ref, atol=1e-5, rtol=1e-5)

    # Default path: bf16 MXU feed (obs + weights quantized; f32 accumulate and
    # f32 elementwise tail) -> looser tolerance by design.
    out_bf16 = jax.block_until_ready(actor_forward(obs, params))
    assert out_bf16.shape == (batch, action_dim)
    assert out_bf16.dtype == jnp.float32
    assert jnp.allclose(out_bf16, ref, atol=2e-2, rtol=2e-2)

    # Multi-step grid + batch-padding path (B=20 -> tb=16, grid=(2,)).
    obs2 = jax.random.normal(jax.random.PRNGKey(1), (20, obs_dim), jnp.float32)
    ref2 = _ref_forward(obs2, params)
    out2 = jax.block_until_ready(
        actor_forward(obs2, params, compute_dtype=jnp.float32))
    assert out2.shape == (20, action_dim)
    assert jnp.allclose(out2, ref2, atol=1e-5, rtol=1e-5)

    print("KERNEL_OK")
</pallas_src>

<mosaic_0001>
module attributes {stable_mosaic.version = 11 : i64} {
  func.func @actor_kernel(%arg0: i32, %arg1: memref<8x32xf32, #tpu.memory_space<vmem>>, %arg2: memref<32x128xf32, #tpu.memory_space<vmem>>, %arg3: memref<1x128xf32, #tpu.memory_space<vmem>>, %arg4: memref<128x128xf32, #tpu.memory_space<vmem>>, %arg5: memref<1x128xf32, #tpu.memory_space<vmem>>, %arg6: memref<128x128xf32, #tpu.memory_space<vmem>>, %arg7: memref<1x128xf32, #tpu.memory_space<vmem>>, %arg8: memref<8x128xf32, #tpu.memory_space<vmem>>) attributes {dimension_semantics = [#tpu.dimension_semantics<parallel>], iteration_bounds = array<i64: 1>, scalar_prefetch = 0 : i64, scratch_operands = 0 : i64, tpu.core_type = #tpu.core_type<tc>, window_params = [{transform_indices = @transform_0, window_bounds = array<i64: 8, 32>}, {pipeline_mode = #tpu.pipeline_mode<synchronous>, transform_indices = @transform_1, window_bounds = array<i64: 32, 128>}, {pipeline_mode = #tpu.pipeline_mode<synchronous>, transform_indices = @transform_2, window_bounds = array<i64: 1, 128>}, {pipeline_mode = #tpu.pipeline_mode<synchronous>, transform_indices = @transform_3, window_bounds = array<i64: 128, 128>}, {pipeline_mode = #tpu.pipeline_mode<synchronous>, transform_indices = @transform_4, window_bounds = array<i64: 1, 128>}, {pipeline_mode = #tpu.pipeline_mode<synchronous>, transform_indices = @transform_5, window_bounds = array<i64: 128, 128>}, {pipeline_mode = #tpu.pipeline_mode<synchronous>, transform_indices = @transform_6, window_bounds = array<i64: 1, 128>}, {transform_indices = @transform_7, window_bounds = array<i64: 8, 128>}]} {
    %c0 = arith.constant 0 : index
    %c0_0 = arith.constant 0 : index
    %0 = vector.load %arg1[%c0, %c0_0] : memref<8x32xf32, #tpu.memory_space<vmem>>, vector<8x32xf32>
    %c0_1 = arith.constant 0 : index
    %c0_2 = arith.constant 0 : index
    %1 = vector.load %arg2[%c0_1, %c0_2] : memref<32x128xf32, #tpu.memory_space<vmem>>, vector<32x128xf32>
    %cst = arith.constant dense<0.000000e+00> : vector<8x128xf32>
    %2 = tpu.matmul %0, %1, %cst {dimension_numbers = #tpu.dot_dimension_numbers<[1], [0], [0], [1], [0, 0, 1, 1], [], []>} : vector<8x32xf32>, vector<32x128xf32>, vector<8x128xf32> -> vector<8x128xf32>
    %c0_3 = arith.constant 0 : index
    %c0_4 = arith.constant 0 : index
    %3 = vector.load %arg3[%c0_3, %c0_4] : memref<1x128xf32, #tpu.memory_space<vmem>>, vector<1x128xf32>
    %4 = vector.broadcast %3 : vector<1x128xf32> to vector<8x128xf32>
    %5 = arith.addf %2, %4 : vector<8x128xf32>
    %cst_5 = arith.constant 0.000000e+00 : f32
    %6 = vector.broadcast %cst_5 : f32 to vector<8x128xf32>
    %7 = arith.maximumf %5, %6 : vector<8x128xf32>
    %c0_6 = arith.constant 0 : index
    %c0_7 = arith.constant 0 : index
    %8 = vector.load %arg4[%c0_6, %c0_7] : memref<128x128xf32, #tpu.memory_space<vmem>>, vector<128x128xf32>
    %cst_8 = arith.constant dense<0.000000e+00> : vector<8x128xf32>
    %9 = tpu.matmul %7, %8, %cst_8 {dimension_numbers = #tpu.dot_dimension_numbers<[1], [0], [0], [1], [0, 0, 1, 1], [], []>} : vector<8x128xf32>, vector<128x128xf32>, vector<8x128xf32> -> vector<8x128xf32>
    %c0_9 = arith.constant 0 : index
    %c0_10 = arith.constant 0 : index
    %10 = vector.load %arg5[%c0_9, %c0_10] : memref<1x128xf32, #tpu.memory_space<vmem>>, vector<1x128xf32>
    %11 = vector.broadcast %10 : vector<1x128xf32> to vector<8x128xf32>
    %12 = arith.addf %9, %11 : vector<8x128xf32>
    %cst_11 = arith.constant 0.000000e+00 : f32
    %13 = vector.broadcast %cst_11 : f32 to vector<8x128xf32>
    %14 = arith.maximumf %12, %13 : vector<8x128xf32>
    %c0_12 = arith.constant 0 : index
    %c0_13 = arith.constant 0 : index
    %15 = vector.load %arg6[%c0_12, %c0_13] : memref<128x128xf32, #tpu.memory_space<vmem>>, vector<128x128xf32>
    %cst_14 = arith.constant dense<0.000000e+00> : vector<8x128xf32>
    %16 = tpu.matmul %14, %15, %cst_14 {dimension_numbers = #tpu.dot_dimension_numbers<[1], [0], [0], [1], [0, 0, 1, 1], [], []>} : vector<8x128xf32>, vector<128x128xf32>, vector<8x128xf32> -> vector<8x128xf32>
    %c0_15 = arith.constant 0 : index
    %c0_16 = arith.constant 0 : index
    %17 = vector.load %arg7[%c0_15, %c0_16] : memref<1x128xf32, #tpu.memory_space<vmem>>, vector<1x128xf32>
    %18 = vector.broadcast %17 : vector<1x128xf32> to vector<8x128xf32>
    %19 = arith.addf %16, %18 : vector<8x128xf32>
    %20 = math.tanh %19 : vector<8x128xf32>
    %c0_17 = arith.constant 0 : index
    %c0_18 = arith.constant 0 : index
    %21 = vector.load %arg8[%c0_17, %c0_18] : memref<8x128xf32, #tpu.memory_space<vmem>>, vector<8x128xf32>
    tpu.vector_store %arg8[%c0_17, %c0_18], %20 {strides = array<i32>} : memref<8x128xf32, #tpu.memory_space<vmem>>, vector<8x128xf32>,
    return
  }
  func.func @transform_0(%arg0: i32) -> (i32, i32) {
    %c0_i32 = arith.constant 0 : i32
    %c0_i32_0 = arith.constant 0 : i32
    return %arg0, %c0_i32 : i32, i32
  }
  func.func @transform_1(%arg0: i32) -> (i32, i32) {
    %c0_i32 = arith.constant 0 : i32
    %c0_i32_0 = arith.constant 0 : i32
    %c0_i32_1 = arith.constant 0 : i32
    return %c0_i32, %c0_i32_0 : i32, i32
  }
  func.func @transform_2(%arg0: i32) -> (i32, i32) {
    %c0_i32 = arith.constant 0 : i32
    %c0_i32_0 = arith.constant 0 : i32
    %c0_i32_1 = arith.constant 0 : i32
    return %c0_i32, %c0_i32_0 : i32, i32
  }
  func.func @transform_3(%arg0: i32) -> (i32, i32) {
    %c0_i32 = arith.constant 0 : i32
    %c0_i32_0 = arith.constant 0 : i32
    %c0_i32_1 = arith.constant 0 : i32
    return %c0_i32, %c0_i32_0 : i32, i32
  }
  func.func @transform_4(%arg0: i32) -> (i32, i32) {
    %c0_i32 = arith.constant 0 : i32
    %c0_i32_0 = arith.constant 0 : i32
    %c0_i32_1 = arith.constant 0 : i32
    return %c0_i32, %c0_i32_0 : i32, i32
  }
  func.func @transform_5(%arg0: i32) -> (i32, i32) {
    %c0_i32 = arith.constant 0 : i32
    %c0_i32_0 = arith.constant 0 : i32
    %c0_i32_1 = arith.constant 0 : i32
    return %c0_i32, %c0_i32_0 : i32, i32
  }
  func.func @transform_6(%arg0: i32) -> (i32, i32) {
    %c0_i32 = arith.constant 0 : i32
    %c0_i32_0 = arith.constant 0 : i32
    %c0_i32_1 = arith.constant 0 : i32
    return %c0_i32, %c0_i32_0 : i32, i32
  }
  func.func @transform_7(%arg0: i32) -> (i32, i32) {
    %c0_i32 = arith.constant 0 : i32
    %c0_i32_0 = arith.constant 0 : i32
    return %arg0, %c0_i32 : i32, i32
  }
}

</mosaic_0001>

<bundles_post_ra>
// kernel: actor_forward.1
= control target key start
LH: loop header
LB: loop body
LE: loop exit
PB: predicated region body
PF: predicated region fallthrough
CT: control target
= control target key end

     0   :  { %v525_v3 = vmov 0.0|0.0   ;;  %vm526_vm0 = vmmov 0   ;;  %v527_v6 = vmov 0.0   ;;  %s722_s0 = inlined_call_operand.vmem [shape: f32[8,32], index: 0, kind: input, shape index: {}]   ;;  %s723_s1 = inlined_call_operand.vmem [shape: f32[32,128], index: 1, kind: input, shape index: {}]   ;;  %s724_s2 = inlined_call_operand.vmem [shape: f32[1,128], index: 2, kind: input, shape index: {}]   ;;  %s725_s3 = inlined_call_operand.vmem [shape: f32[128,128], index: 3, kind: input, shape index: {}]   ;;  %s726_s4 = inlined_call_operand.vmem [shape: f32[1,128], index: 4, kind: input, shape index: {}]   ;;  %s727_s5 = inlined_call_operand.vmem [shape: f32[128,128], index: 5, kind: input, shape index: {}]   ;;  %s728_s6 = inlined_call_operand.vmem [shape: f32[1,128], index: 6, kind: input, shape index: {}]   ;;  %s729_s7 = inlined_call_operand.hbm [shape: f32[8,128], index: 7, kind: output, shape index: {}]  }
   0x1   :  { %v28_v0 = vld [vmem:[%s723_s1] sm:$0xff]  ;;  %v29_v1 = vld [vmem:[%s723_s1 + $0x8] sm:$0xff]  ;;  %v30_v2 = vld [vmem:[%s723_s1 + $0x10] sm:$0xff]  ;;  %441 = vmatprep.subr.bf16.mxu0 %v525_v3  ;;  %368 = vmatprep.mubr.msk.f32.mxu0 %vm526_vm0, %v527_v6 }
   0x2   :  { %v442_v4 = vpack.c.bf16 %v29_v1, %v28_v0  ;;  %v31_v5 = vld [vmem:[%s723_s1 + $0x18] sm:$0xff]  ;;  %v114_v7 = vld [vmem:[%s725_s3] sm:$0xff]  ;;  %447 = vmatprep.subr.bf16.mxu1 %v525_v3  ;;  %v115_v8 = vld [vmem:[%s725_s3 + $0x8] sm:$0xff]  ;;  %403 = vmatprep.mubr.msk.f32.mxu1 %vm526_vm0, %v527_v6 }
   0x3   :  { %v116_v9 = vld [vmem:[%s725_s3 + $0x10] sm:$0xff]  ;;  %v117_v10 = vld [vmem:[%s725_s3 + $0x18] sm:$0xff]  ;;  %v445_v11 = vpack.c.bf16 %v31_v5, %v30_v2  ;;  %v448_v12 = vpack.c.bf16 %v115_v8, %v114_v7  ;;  %v118_v14 = vld [vmem:[%s725_s3 + $0x20] sm:$0xff] }
   0x4   :  { %443 = vmatpush3.bf16.msra.mxu0 %v442_v4  ;;  %v451_v13 = vpack.c.bf16 %v117_v10, %v116_v9  ;;  %v119_v15 = vld [vmem:[%s725_s3 + $0x28] sm:$0xff] }
   0x5   :  { %444 = vmatprep.subr.bf16.mxu0 %v525_v3  ;;  %449 = vmatpush3.bf16.msra.mxu1 %v448_v12 }
   0x6   :  { %450 = vmatprep.subr.bf16.mxu1 %v525_v3 }
   0x7   :  { %12 = vsyncpa [#allocation3], 0  ;;  %v27_v16 = vld [vmem:[%s722_s0] sm:$0xff]  ;;  %vm39_vm1 = vcmask 261120   ;;  %v454_v17 = vpack.c.bf16 %v119_v15, %v118_v14  ;;  %v120_v18 = vld [vmem:[%s725_s3 + $0x30] sm:$0xff] }
   0x8   :  { %446 = vmatpush3.bf16.msra.mxu0 %v445_v11  ;;  %v121_v19 = vld [vmem:[%s725_s3 + $0x38] sm:$0xff]  ;;  %v122_v21 = vld [vmem:[%s725_s3 + $0x40] sm:$0xff]  ;;  %v123_v22 = vld [vmem:[%s725_s3 + $0x48] sm:$0xff] }
   0x9   :  { %471 = vmatprep.subr.bf16.mxu0 %v525_v3  ;;  %452 = vmatpush3.bf16.msra.mxu1 %v451_v13  ;;  %v457_v20 = vpack.c.bf16 %v121_v19, %v120_v18  ;;  %v460_v23 = vpack.c.bf16 %v123_v22, %v122_v21  ;;  %v124_v24 = vld [vmem:[%s725_s3 + $0x50] sm:$0xff]  ;;  %v125_v25 = vld [vmem:[%s725_s3 + $0x58] sm:$0xff]  ;;  %v126_v27 = vld [vmem:[%s725_s3 + $0x60] sm:$0xff] }
   0xa   :  { %453 = vmatprep.subr.bf16.mxu1 %v525_v3  ;;  %v463_v26 = vpack.c.bf16 %v125_v25, %v124_v24  ;;  %v127_v28 = vld [vmem:[%s725_s3 + $0x68] sm:$0xff]  ;;  %v128_v30 = vld [vmem:[%s725_s3 + $0x70] sm:$0xff]  ;;  %v129_v31 = vld [vmem:[%s725_s3 + $0x78] sm:$0xff] }
   0xb   :  { %369 = vmatmul.mubr.msk.f32.vlgmr.msra.gmra.mrb[0].mxu0 %vm39_vm1, %v27_v16  ;;  %v466_v29 = vpack.c.bf16 %v127_v28, %v126_v27  ;;  %v469_v32 = vpack.c.bf16 %v129_v31, %v128_v30  ;;  %v208_v33 = vld [vmem:[%s727_s5] sm:$0xff]  ;;  %v209_v34 = vld [vmem:[%s727_s5 + $0x8] sm:$0xff]  ;;  %v210_v35 = vld [vmem:[%s727_s5 + $0x10] sm:$0xff] }
   0xc   :  { %438 = vmatprep.mubr.msk.f32.mxu0 %vm526_vm0, %v527_v6  ;;  %v472_v36 = vpack.c.bf16 %v209_v34, %v208_v33  ;;  %v211_v37 = vld [vmem:[%s727_s5 + $0x18] sm:$0xff]  ;;  %v212_v39 = vld [vmem:[%s727_s5 + $0x20] sm:$0xff]  ;;  %v213_v40 = vld [vmem:[%s727_s5 + $0x28] sm:$0xff] }
   0xd   :  { %455 = vmatpush3.bf16.msra.mxu1 %v454_v17  ;;  %v475_v38 = vpack.c.bf16 %v211_v37, %v210_v35  ;;  %v478_v41 = vpack.c.bf16 %v213_v40, %v212_v39  ;;  %v214_v42 = vld [vmem:[%s727_s5 + $0x30] sm:$0xff]  ;;  %v215_v43 = vld [vmem:[%s727_s5 + $0x38] sm:$0xff]  ;;  %v216_v45 = vld [vmem:[%s727_s5 + $0x40] sm:$0xff] }
   0xe   :  { %456 = vmatprep.subr.bf16.mxu1 %v525_v3  ;;  %473 = vmatpush3.bf16.msra.mxu0 %v472_v36  ;;  %v481_v44 = vpack.c.bf16 %v215_v43, %v214_v42  ;;  %v217_v46 = vld [vmem:[%s727_s5 + $0x48] sm:$0xff]  ;;  %v218_v48 = vld [vmem:[%s727_s5 + $0x50] sm:$0xff]  ;;  %v219_v49 = vld [vmem:[%s727_s5 + $0x58] sm:$0xff] }
   0xf   :  { %474 = vmatprep.subr.bf16.mxu0 %v525_v3  ;;  %v484_v47 = vpack.c.bf16 %v217_v46, %v216_v45  ;;  %v487_v50 = vpack.c.bf16 %v219_v49, %v218_v48  ;;  %v220_v51 = vld [vmem:[%s727_s5 + $0x60] sm:$0xff]  ;;  %v221_v52 = vld [vmem:[%s727_s5 + $0x68] sm:$0xff]  ;;  %v222_v59 = vld [vmem:[%s727_s5 + $0x70] sm:$0xff] }
  0x10   :  { %v490_v53 = vpack.c.bf16 %v221_v52, %v220_v51  ;;  %v317_v54 = vld [vmem:[%s724_s2] ss:$0 sm:$0xff]  ;;  %v223_v60 = vld [vmem:[%s727_s5 + $0x78] sm:$0xff]  ;;  %s528_s5 = smov [#allocation2]  }
  0x11   :  { %458 = vmatpush3.bf16.msra.mxu1 %v457_v20  ;;  %v493_v61 = vpack.c.bf16 %v223_v60, %v222_v59  ;;  %v319_v62 = vld [vmem:[%s726_s4] ss:$0 sm:$0xff]  ;;  %s309_s26 = sshll.u32 %s528_s5, 4  ;;  %s310_s26 = int_to_ptr.vmem [resolvable:$true] %s309_s26 }
  0x12   :  { %459 = vmatprep.subr.bf16.mxu1 %v525_v3  ;;  %476 = vmatpush3.bf16.msra.mxu0 %v475_v38  ;;  %s501_s27 = scalar_lea.vmem %s310_s26, 128  ;;  %p506_p1 = scmp.lt.s32.totalorder %s310_s26, %s310_s26 }
  0x13   :  { %477 = vmatprep.subr.bf16.mxu0 %v525_v3  ;;  %p502_p0 = scmp.ne.s32.totalorder %s310_s26, %s501_s27  ;;  %p507_p2 = scmp.lt.s32.totalorder %s501_s27, %s501_s27 }
  0x15   :  { %461 = vmatpush3.bf16.msra.mxu1 %v460_v23  ;;  %p508_p3 = por %p507_p2, %p506_p1 }
  0x16   :  { %462 = vmatprep.subr.bf16.mxu1 %v525_v3  ;;  %479 = vmatpush3.bf16.msra.mxu0 %v478_v41 }
  0x17   :  { %480 = vmatprep.subr.bf16.mxu0 %v525_v3  ;;  %p509_p4 = pnand %p508_p3, %p502_p0 }
  0x19   :  { %464 = vmatpush3.bf16.msra.mxu1 %v463_v26 }
  0x1a   :  { %465 = vmatprep.subr.bf16.mxu1 %v525_v3  ;;  %482 = vmatpush3.bf16.msra.mxu0 %v481_v44 }
  0x1b   :  { %483 = vmatprep.subr.bf16.mxu0 %v525_v3 }
  0x1d   :  { %467 = vmatpush3.bf16.msra.mxu1 %v466_v29 }
  0x1e   :  { %468 = vmatprep.subr.bf16.mxu1 %v525_v3  ;;  %485 = vmatpush3.bf16.msra.mxu0 %v484_v47 }
  0x1f   :  { %486 = vmatprep.subr.bf16.mxu0 %v525_v3 }
  0x21   :  { %470 = vmatpush3.bf16.msra.mxu1 %v469_v32 }
  0x22   :  { %488 = vmatpush3.bf16.msra.mxu0 %v487_v50 }
  0x23   :  { %489 = vmatprep.subr.bf16.mxu0 %v525_v3 }
  0x26   :  { %491 = vmatpush3.bf16.msra.mxu0 %v490_v53 }
  0x27   :  { %492 = vmatprep.subr.bf16.mxu0 %v525_v3  ;;  %v320_v3 = vld [vmem:[%s728_s6] ss:$0 sm:$0xff] }
  0x2a   :  { %494 = vmatpush3.bf16.msra.mxu0 %v493_v61 }
  0xde   :  { %v109_v55 = vpop.f32.mrb[0].mxu0 }
  0xdf   :  { %v110_v56 = vadd.f32 %v317_v54, %v109_v55  ;;  %v370_v57 = vpop.f32.mrb[1].mxu0 }
  0xe1   :  { %v113_v58 = vmax.f32 %v110_v56, 0.0 }
  0xe3   :  { %404 = vmatmul.mubr.f32.vlgmr.msra.gmra.mrb[0].mxu1 %v113_v58 }
 0x1b6   :  { %v203_v63 = vpop.f32.mrb[0].mxu1 }
 0x1b7   :  { %v204_v0 = vadd.f32 %v319_v62, %v203_v63  ;;  %v405_v1 = vpop.f32.mrb[1].mxu1 }
 0x1b9   :  { %v207_v2 = vmax.f32 %v204_v0, 0.0 }
 0x1bb   :  { %439 = vmatmul.mubr.f32.vlgmr.msra.gmra.mrb[2].mxu0 %v207_v2 }
 0x28e   :  { %v297_v4 = vpop.f32.mrb[2].mxu0 }
 0x28f   :  { %v298_v5 = vadd.f32 %v320_v3, %v297_v4  ;;  %v440_v6 = vpop.f32.mrb[3].mxu0 }
 0x291   :  { %499 = vtanh.f32 %v298_v5 }
 0x29b   :  { %v500_v7 = vpop.eup %499 }
 0x29c   :  { %302 = vst [vmem:[#allocation2] sm:$0xff] %v500_v7 }
 0x29d   :  { %512 = shalt.err (!%p509_p4)
}
 0x29e   :  { %s513_s6 = scalar_lea.hbm %s729_s7, 128 }
 0x29f   :  { %p514_p5 = scmp.ne.s32.totalorder %s729_s7, %s513_s6  ;;  %p517_p6 = scmp.lt.u32.totalorder %s513_s6, %s729_s7 }
 0x2a1   :  { %p519_p7 = pnand %p517_p6, %p514_p5 }
 0x2a3   :  { %522 = shalt.err (!%p519_p7)
}
 0x2a4   :  { %312 = dma.vmem_to_hbm [thread:$0]  %s310_s26, 128, %s729_s7, [#allocation3]  }
 0x2a5   :  { %523 = dma.done.wait [#allocation3], 128  }
 0x2a6   :  { %524 = vsyncadd [#allocation3], 4294967168 }
 0x2a7   :  { %316 = vsyncpa [#allocation3], 1 }

</bundles_post_ra>
